<compile_context>
chip_gen: v6e
topology: v6e:2x2x1
jax: 0.10.0
libtpu: 0.0.40
codegen_flags: <defaults>
</compile_context>

<pallas_src>
import functools

import numpy as np

import jax
import jax.numpy as jnp
from jax.experimental import pallas as pl
from jax.experimental.pallas import tpu as pltpu


def _double_conv_kernel(x_ref, m_ref, w1_ref, b1_ref, w2_ref, b2_ref, o_ref,
                        *, H, W):
    """Fused (3x3 conv + bias + ReLU) x2 for one batch element.

    x_ref:  (1, Cin,  H*W)   NCHW input, spatial dims flattened onto lanes
    m_ref:  (9, 1,   H*W)    per-tap 0/1 boundary masks (halo handling)
    w1_ref: (9, Cout, Cin)   conv1 weights, tap-major (tap = dy*3 + dx)
    b1_ref: (Cout, 1)        conv1 bias
    w2_ref: (9, Cout, Cout)  conv2 weights
    b2_ref: (Cout, 1)        conv2 bias
    o_ref:  (1, Cout, H*W)   output (already NCHW layout)
    """
    HW = H * W

    def conv3x3_bias_relu(x2d, w_ref, b_ref):
        cout = w_ref.shape[1]
        acc = jnp.zeros((cout, HW), jnp.float32)
        for dy in range(3):
            for dx in range(3):
                tap = dy * 3 + dx
                k = (dy - 1) * W + (dx - 1)      # flat spatial offset of this tap
                if k == 0:
                    xs = x2d                      # center tap: no shift, no mask
                else:
                    # shifted[p] = x[p + k] (zero where it would leave the image)
                    xs = pltpu.roll(x2d, shift=(-k) % HW, axis=1) * m_ref[tap]
                acc = acc + jnp.dot(w_ref[tap], xs,
                                    preferred_element_type=jnp.float32)
        return jnp.maximum(acc + b_ref[...], 0.0)

    x = x_ref[0]                                  # (Cin, HW)
    y1 = conv3x3_bias_relu(x, w1_ref, b1_ref)     # intermediate stays on-chip
    y2 = conv3x3_bias_relu(y1, w2_ref, b2_ref)    # (Cout, HW)
    o_ref[0] = y2.astype(o_ref.dtype)


def _tap_masks(H, W):
    """(9, 1, H*W) 0/1 masks: zero where tap (dy, dx) would read outside the image."""
    yy, xx = np.meshgrid(np.arange(H), np.arange(W), indexing="ij")
    yy = yy.reshape(-1)
    xx = xx.reshape(-1)
    masks = np.ones((9, 1, H * W), dtype=np.float32)
    for dy in range(3):
        for dx in range(3):
            oy, ox = dy - 1, dx - 1
            valid = ((yy + oy >= 0) & (yy + oy < H) &
                     (xx + ox >= 0) & (xx + ox < W))
            masks[dy * 3 + dx, 0, :] = valid.astype(np.float32)
    return jnp.asarray(masks)


@jax.jit
def double_conv(x_nchw, w1, b1, w2, b2):
    """DoubleConv forward.

    x_nchw: (N, Cin, H, W)
    w1: (Cout, Cin, 3, 3), b1: (Cout,)    -- PyTorch Conv2d parameter layout
    w2: (Cout, Cout, 3, 3), b2: (Cout,)
    returns: (N, Cout, H, W)
    """
    N, Cin, H, W = x_nchw.shape
    Cout = w1.shape[0]
    HW = H * W

    x = x_nchw.reshape(N, Cin, HW).astype(jnp.float32)  # pure reshape, no copy
    masks = _tap_masks(H, W)                             # trace-time constant
    # (Cout, Cin, kh, kw) -> (kh*kw, Cout, Cin), tap = dy*3 + dx
    w1k = jnp.transpose(w1, (2, 3, 0, 1)).reshape(9, Cout, Cin).astype(jnp.float32)
    w2k = jnp.transpose(w2, (2, 3, 0, 1)).reshape(9, Cout, Cout).astype(jnp.float32)
    b1k = b1.reshape(Cout, 1).astype(jnp.float32)
    b2k = b2.reshape(Cout, 1).astype(jnp.float32)

    kernel = functools.partial(_double_conv_kernel, H=H, W=W)
    # TODO(synk): for large H*W / channel counts add spatial tiling with a 1-row
    # halo (sized against v7x's 64 MiB VMEM); the whole-image block is fine at
    # UNet tile sizes like 16x16.
    out = pl.pallas_call(
        kernel,
        out_shape=jax.ShapeDtypeStruct((N, Cout, HW), jnp.float32),
        grid_spec=pltpu.PrefetchScalarGridSpec(
            num_scalar_prefetch=0,
            grid=(N,),
            in_specs=[
                pl.BlockSpec((1, Cin, HW), lambda n: (n, 0, 0)),
                pl.BlockSpec((9, 1, HW), lambda n: (0, 0, 0)),
                pl.BlockSpec((9, Cout, Cin), lambda n: (0, 0, 0)),
                pl.BlockSpec((Cout, 1), lambda n: (0, 0)),
                pl.BlockSpec((9, Cout, Cout), lambda n: (0, 0, 0)),
                pl.BlockSpec((Cout, 1), lambda n: (0, 0)),
            ],
            out_specs=pl.BlockSpec((1, Cout, HW), lambda n: (n, 0, 0)),
        ),
        compiler_params=pltpu.CompilerParams(
            dimension_semantics=("parallel",)),
    )(x, masks, w1k, b1k, w2k, b2k)
    return out.reshape(N, Cout, H, W)


def _reference_double_conv(x_nchw, w1, b1, w2, b2):
    """Pure-JAX reference (lax.conv, PyTorch OIHW weights) for correctness check."""
    def conv(x, w, b):
        y = jax.lax.conv_general_dilated(
            x, w, window_strides=(1, 1), padding=((1, 1), (1, 1)),
            dimension_numbers=("NCHW", "OIHW", "NCHW"))
        return jnp.maximum(y + b.reshape(1, -1, 1, 1), 0.0)
    return conv(conv(x_nchw, w1, b1), w2, b2)


if __name__ == "__main__":
    # Small shapes consistent with the module: inchannels=4, outchannels=8.
    N, Cin, Cout, H, W = 2, 4, 8, 16, 16

    key = jax.random.PRNGKey(0)
    kx, kw1, kb1, kw2, kb2 = jax.random.split(key, 5)

    x = jax.random.normal(kx, (N, Cin, H, W), dtype=jnp.float32)
    # PyTorch Conv2d layout: (Cout, Cin, kh, kw) and (Cout,).
    w1 = jax.random.normal(kw1, (Cout, Cin, 3, 3), dtype=jnp.float32) * 0.1
    b1 = jax.random.normal(kb1, (Cout,), dtype=jnp.float32) * 0.1
    w2 = jax.random.normal(kw2, (Cout, Cout, 3, 3), dtype=jnp.float32) * 0.1
    b2 = jax.random.normal(kb2, (Cout,), dtype=jnp.float32) * 0.1

    out = jax.block_until_ready(double_conv(x, w1, b1, w2, b2))
    ref = _reference_double_conv(x, w1, b1, w2, b2)
    assert out.shape == (N, Cout, H, W), out.shape
    assert jnp.allclose(out, ref, atol=1e-4, rtol=1e-4), "mismatch vs reference"

    print("KERNEL_OK")
</pallas_src>

<mosaic_0001>
module attributes {stable_mosaic.version = 11 : i64} {
  func.func @_double_conv_kernel(%arg0: i32, %arg1: memref<1x4x256xf32, #tpu.memory_space<vmem>>, %arg2: memref<9x1x256xf32, #tpu.memory_space<vmem>>, %arg3: memref<9x8x4xf32, #tpu.memory_space<vmem>>, %arg4: memref<8x1xf32, #tpu.memory_space<vmem>>, %arg5: memref<9x8x8xf32, #tpu.memory_space<vmem>>, %arg6: memref<8x1xf32, #tpu.memory_space<vmem>>, %arg7: memref<1x8x256xf32, #tpu.memory_space<vmem>>) attributes {dimension_semantics = [#tpu.dimension_semantics<parallel>], iteration_bounds = array<i64: 2>, scalar_prefetch = 0 : i64, scratch_operands = 0 : i64, tpu.core_type = #tpu.core_type<tc>, window_params = [{transform_indices = @transform_0, window_bounds = array<i64: 1, 4, 256>}, {pipeline_mode = #tpu.pipeline_mode<synchronous>, transform_indices = @transform_1, window_bounds = array<i64: 9, 1, 256>}, {pipeline_mode = #tpu.pipeline_mode<synchronous>, transform_indices = @transform_2, window_bounds = array<i64: 9, 8, 4>}, {pipeline_mode = #tpu.pipeline_mode<synchronous>, transform_indices = @transform_3, window_bounds = array<i64: 8, 1>}, {pipeline_mode = #tpu.pipeline_mode<synchronous>, transform_indices = @transform_4, window_bounds = array<i64: 9, 8, 8>}, {pipeline_mode = #tpu.pipeline_mode<synchronous>, transform_indices = @transform_5, window_bounds = array<i64: 8, 1>}, {transform_indices = @transform_6, window_bounds = array<i64: 1, 8, 256>}]} {
    %c0 = arith.constant 0 : index
    %c0_0 = arith.constant 0 : index
    %c0_1 = arith.constant 0 : index
    %0 = vector.load %arg1[%c0, %c0_0, %c0_1] : memref<1x4x256xf32, #tpu.memory_space<vmem>>, vector<1x4x256xf32>
    %1 = vector.shape_cast %0 : vector<1x4x256xf32> to vector<4x256xf32>
    %cst = arith.constant 0.000000e+00 : f32
    %2 = vector.broadcast %cst : f32 to vector<8x256xf32>
    %c17_i32 = arith.constant 17 : i32
    %3 = tpu.dynamic_rotate %1 by %c17_i32 dim 1 : vector<4x256xf32>, i32 -> vector<4x256xf32>
    %c0_2 = arith.constant 0 : index
    %c0_3 = arith.constant 0 : index
    %c0_4 = arith.constant 0 : index
    %4 = vector.load %arg2[%c0_2, %c0_3, %c0_4] : memref<9x1x256xf32, #tpu.memory_space<vmem>>, vector<1x1x256xf32>
    %5 = vector.shape_cast %4 : vector<1x1x256xf32> to vector<1x256xf32>
    %6 = vector.broadcast %5 : vector<1x256xf32> to vector<4x256xf32>
    %7 = arith.mulf %3, %6 : vector<4x256xf32>
    %c0_5 = arith.constant 0 : index
    %c0_6 = arith.constant 0 : index
    %c0_7 = arith.constant 0 : index
    %8 = vector.load %arg3[%c0_5, %c0_6, %c0_7] : memref<9x8x4xf32, #tpu.memory_space<vmem>>, vector<1x8x4xf32>
    %9 = vector.shape_cast %8 : vector<1x8x4xf32> to vector<8x4xf32>
    %cst_8 = arith.constant dense<0.000000e+00> : vector<8x256xf32>
    %10 = tpu.matmul %9, %7, %cst_8 {dimension_numbers = #tpu.dot_dimension_numbers<[1], [0], [0], [1], [0, 0, 1, 1], [], []>} : vector<8x4xf32>, vector<4x256xf32>, vector<8x256xf32> -> vector<8x256xf32>
    %11 = arith.addf %2, %10 : vector<8x256xf32>
    %c16_i32 = arith.constant 16 : i32
    %12 = tpu.dynamic_rotate %1 by %c16_i32 dim 1 : vector<4x256xf32>, i32 -> vector<4x256xf32>
    %c1 = arith.constant 1 : index
    %c0_9 = arith.constant 0 : index
    %c0_10 = arith.constant 0 : index
    %13 = vector.load %arg2[%c1, %c0_9, %c0_10] : memref<9x1x256xf32, #tpu.memory_space<vmem>>, vector<1x1x256xf32>
    %14 = vector.shape_cast %13 : vector<1x1x256xf32> to vector<1x256xf32>
    %15 = vector.broadcast %14 : vector<1x256xf32> to vector<4x256xf32>
    %16 = arith.mulf %12, %15 : vector<4x256xf32>
    %c1_11 = arith.constant 1 : index
    %c0_12 = arith.constant 0 : index
    %c0_13 = arith.constant 0 : index
    %17 = vector.load %arg3[%c1_11, %c0_12, %c0_13] : memref<9x8x4xf32, #tpu.memory_space<vmem>>, vector<1x8x4xf32>
    %18 = vector.shape_cast %17 : vector<1x8x4xf32> to vector<8x4xf32>
    %cst_14 = arith.constant dense<0.000000e+00> : vector<8x256xf32>
    %19 = tpu.matmul %18, %16, %cst_14 {dimension_numbers = #tpu.dot_dimension_numbers<[1], [0], [0], [1], [0, 0, 1, 1], [], []>} : vector<8x4xf32>, vector<4x256xf32>, vector<8x256xf32> -> vector<8x256xf32>
    %20 = arith.addf %11, %19 : vector<8x256xf32>
    %c15_i32 = arith.constant 15 : i32
    %21 = tpu.dynamic_rotate %1 by %c15_i32 dim 1 : vector<4x256xf32>, i32 -> vector<4x256xf32>
    %c2 = arith.constant 2 : index
    %c0_15 = arith.constant 0 : index
    %c0_16 = arith.constant 0 : index
    %22 = vector.load %arg2[%c2, %c0_15, %c0_16] : memref<9x1x256xf32, #tpu.memory_space<vmem>>, vector<1x1x256xf32>
    %23 = vector.shape_cast %22 : vector<1x1x256xf32> to vector<1x256xf32>
    %24 = vector.broadcast %23 : vector<1x256xf32> to vector<4x256xf32>
    %25 = arith.mulf %21, %24 : vector<4x256xf32>
    %c2_17 = arith.constant 2 : index
    %c0_18 = arith.constant 0 : index
    %c0_19 = arith.constant 0 : index
    %26 = vector.load %arg3[%c2_17, %c0_18, %c0_19] : memref<9x8x4xf32, #tpu.memory_space<vmem>>, vector<1x8x4xf32>
    %27 = vector.shape_cast %26 : vector<1x8x4xf32> to vector<8x4xf32>
    %cst_20 = arith.constant dense<0.000000e+00> : vector<8x256xf32>
    %28 = tpu.matmul %27, %25, %cst_20 {dimension_numbers = #tpu.dot_dimension_numbers<[1], [0], [0], [1], [0, 0, 1, 1], [], []>} : vector<8x4xf32>, vector<4x256xf32>, vector<8x256xf32> -> vector<8x256xf32>
    %29 = arith.addf %20, %28 : vector<8x256xf32>
    %c1_i32 = arith.constant 1 : i32
    %30 = tpu.dynamic_rotate %1 by %c1_i32 dim 1 : vector<4x256xf32>, i32 -> vector<4x256xf32>
    %c3 = arith.constant 3 : index
    %c0_21 = arith.constant 0 : index
    %c0_22 = arith.constant 0 : index
    %31 = vector.load %arg2[%c3, %c0_21, %c0_22] : memref<9x1x256xf32, #tpu.memory_space<vmem>>, vector<1x1x256xf32>
    %32 = vector.shape_cast %31 : vector<1x1x256xf32> to vector<1x256xf32>
    %33 = vector.broadcast %32 : vector<1x256xf32> to vector<4x256xf32>
    %34 = arith.mulf %30, %33 : vector<4x256xf32>
    %c3_23 = arith.constant 3 : index
    %c0_24 = arith.constant 0 : index
    %c0_25 = arith.constant 0 : index
    %35 = vector.load %arg3[%c3_23, %c0_24, %c0_25] : memref<9x8x4xf32, #tpu.memory_space<vmem>>, vector<1x8x4xf32>
    %36 = vector.shape_cast %35 : vector<1x8x4xf32> to vector<8x4xf32>
    %cst_26 = arith.constant dense<0.000000e+00> : vector<8x256xf32>
    %37 = tpu.matmul %36, %34, %cst_26 {dimension_numbers = #tpu.dot_dimension_numbers<[1], [0], [0], [1], [0, 0, 1, 1], [], []>} : vector<8x4xf32>, vector<4x256xf32>, vector<8x256xf32> -> vector<8x256xf32>
    %38 = arith.addf %29, %37 : vector<8x256xf32>
    %c4 = arith.constant 4 : index
    %c0_27 = arith.constant 0 : index
    %c0_28 = arith.constant 0 : index
    %39 = vector.load %arg3[%c4, %c0_27, %c0_28] : memref<9x8x4xf32, #tpu.memory_space<vmem>>, vector<1x8x4xf32>
    %40 = vector.shape_cast %39 : vector<1x8x4xf32> to vector<8x4xf32>
    %cst_29 = arith.constant dense<0.000000e+00> : vector<8x256xf32>
    %41 = tpu.matmul %40, %1, %cst_29 {dimension_numbers = #tpu.dot_dimension_numbers<[1], [0], [0], [1], [0, 0, 1, 1], [], []>} : vector<8x4xf32>, vector<4x256xf32>, vector<8x256xf32> -> vector<8x256xf32>
    %42 = arith.addf %38, %41 : vector<8x256xf32>
    %c255_i32 = arith.constant 255 : i32
    %43 = tpu.dynamic_rotate %1 by %c255_i32 dim 1 : vector<4x256xf32>, i32 -> vector<4x256xf32>
    %c5 = arith.constant 5 : index
    %c0_30 = arith.constant 0 : index
    %c0_31 = arith.constant 0 : index
    %44 = vector.load %arg2[%c5, %c0_30, %c0_31] : memref<9x1x256xf32, #tpu.memory_space<vmem>>, vector<1x1x256xf32>
    %45 = vector.shape_cast %44 : vector<1x1x256xf32> to vector<1x256xf32>
    %46 = vector.broadcast %45 : vector<1x256xf32> to vector<4x256xf32>
    %47 = arith.mulf %43, %46 : vector<4x256xf32>
    %c5_32 = arith.constant 5 : index
    %c0_33 = arith.constant 0 : index
    %c0_34 = arith.constant 0 : index
    %48 = vector.load %arg3[%c5_32, %c0_33, %c0_34] : memref<9x8x4xf32, #tpu.memory_space<vmem>>, vector<1x8x4xf32>
    %49 = vector.shape_cast %48 : vector<1x8x4xf32> to vector<8x4xf32>
    %cst_35 = arith.constant dense<0.000000e+00> : vector<8x256xf32>
    %50 = tpu.matmul %49, %47, %cst_35 {dimension_numbers = #tpu.dot_dimension_numbers<[1], [0], [0], [1], [0, 0, 1, 1], [], []>} : vector<8x4xf32>, vector<4x256xf32>, vector<8x256xf32> -> vector<8x256xf32>
    %51 = arith.addf %42, %50 : vector<8x256xf32>
    %c241_i32 = arith.constant 241 : i32
    %52 = tpu.dynamic_rotate %1 by %c241_i32 dim 1 : vector<4x256xf32>, i32 -> vector<4x256xf32>
    %c6 = arith.constant 6 : index
    %c0_36 = arith.constant 0 : index
    %c0_37 = arith.constant 0 : index
    %53 = vector.load %arg2[%c6, %c0_36, %c0_37] : memref<9x1x256xf32, #tpu.memory_space<vmem>>, vector<1x1x256xf32>
    %54 = vector.shape_cast %53 : vector<1x1x256xf32> to vector<1x256xf32>
    %55 = vector.broadcast %54 : vector<1x256xf32> to vector<4x256xf32>
    %56 = arith.mulf %52, %55 : vector<4x256xf32>
    %c6_38 = arith.constant 6 : index
    %c0_39 = arith.constant 0 : index
    %c0_40 = arith.constant 0 : index
    %57 = vector.load %arg3[%c6_38, %c0_39, %c0_40] : memref<9x8x4xf32, #tpu.memory_space<vmem>>, vector<1x8x4xf32>
    %58 = vector.shape_cast %57 : vector<1x8x4xf32> to vector<8x4xf32>
    %cst_41 = arith.constant dense<0.000000e+00> : vector<8x256xf32>
    %59 = tpu.matmul %58, %56, %cst_41 {dimension_numbers = #tpu.dot_dimension_numbers<[1], [0], [0], [1], [0, 0, 1, 1], [], []>} : vector<8x4xf32>, vector<4x256xf32>, vector<8x256xf32> -> vector<8x256xf32>
    %60 = arith.addf %51, %59 : vector<8x256xf32>
    %c240_i32 = arith.constant 240 : i32
    %61 = tpu.dynamic_rotate %1 by %c240_i32 dim 1 : vector<4x256xf32>, i32 -> vector<4x256xf32>
    %c7 = arith.constant 7 : index
    %c0_42 = arith.constant 0 : index
    %c0_43 = arith.constant 0 : index
    %62 = vector.load %arg2[%c7, %c0_42, %c0_43] : memref<9x1x256xf32, #tpu.memory_space<vmem>>, vector<1x1x256xf32>
    %63 = vector.shape_cast %62 : vector<1x1x256xf32> to vector<1x256xf32>
    %64 = vector.broadcast %63 : vector<1x256xf32> to vector<4x256xf32>
    %65 = arith.mulf %61, %64 : vector<4x256xf32>
    %c7_44 = arith.constant 7 : index
    %c0_45 = arith.constant 0 : index
    %c0_46 = arith.constant 0 : index
    %66 = vector.load %arg3[%c7_44, %c0_45, %c0_46] : memref<9x8x4xf32, #tpu.memory_space<vmem>>, vector<1x8x4xf32>
    %67 = vector.shape_cast %66 : vector<1x8x4xf32> to vector<8x4xf32>
    %cst_47 = arith.constant dense<0.000000e+00> : vector<8x256xf32>
    %68 = tpu.matmul %67, %65, %cst_47 {dimension_numbers = #tpu.dot_dimension_numbers<[1], [0], [0], [1], [0, 0, 1, 1], [], []>} : vector<8x4xf32>, vector<4x256xf32>, vector<8x256xf32> -> vector<8x256xf32>
    %69 = arith.addf %60, %68 : vector<8x256xf32>
    %c239_i32 = arith.constant 239 : i32
    %70 = tpu.dynamic_rotate %1 by %c239_i32 dim 1 : vector<4x256xf32>, i32 -> vector<4x256xf32>
    %c8 = arith.constant 8 : index
    %c0_48 = arith.constant 0 : index
    %c0_49 = arith.constant 0 : index
    %71 = vector.load %arg2[%c8, %c0_48, %c0_49] : memref<9x1x256xf32, #tpu.memory_space<vmem>>, vector<1x1x256xf32>
    %72 = vector.shape_cast %71 : vector<1x1x256xf32> to vector<1x256xf32>
    %73 = vector.broadcast %72 : vector<1x256xf32> to vector<4x256xf32>
    %74 = arith.mulf %70, %73 : vector<4x256xf32>
    %c8_50 = arith.constant 8 : index
    %c0_51 = arith.constant 0 : index
    %c0_52 = arith.constant 0 : index
    %75 = vector.load %arg3[%c8_50, %c0_51, %c0_52] : memref<9x8x4xf32, #tpu.memory_space<vmem>>, vector<1x8x4xf32>
    %76 = vector.shape_cast %75 : vector<1x8x4xf32> to vector<8x4xf32>
    %cst_53 = arith.constant dense<0.000000e+00> : vector<8x256xf32>
    %77 = tpu.matmul %76, %74, %cst_53 {dimension_numbers = #tpu.dot_dimension_numbers<[1], [0], [0], [1], [0, 0, 1, 1], [], []>} : vector<8x4xf32>, vector<4x256xf32>, vector<8x256xf32> -> vector<8x256xf32>
    %78 = arith.addf %69, %77 : vector<8x256xf32>
    %c0_54 = arith.constant 0 : index
    %c0_55 = arith.constant 0 : index
    %79 = vector.load %arg4[%c0_54, %c0_55] : memref<8x1xf32, #tpu.memory_space<vmem>>, vector<8x1xf32>
    %80 = vector.broadcast %79 : vector<8x1xf32> to vector<8x256xf32>
    %81 = arith.addf %78, %80 : vector<8x256xf32>
    %cst_56 = arith.constant 0.000000e+00 : f32
    %82 = vector.broadcast %cst_56 : f32 to vector<8x256xf32>
    %83 = arith.maximumf %81, %82 : vector<8x256xf32>
    %cst_57 = arith.constant 0.000000e+00 : f32
    %84 = vector.broadcast %cst_57 : f32 to vector<8x256xf32>
    %c17_i32_58 = arith.constant 17 : i32
    %85 = tpu.dynamic_rotate %83 by %c17_i32_58 dim 1 : vector<8x256xf32>, i32 -> vector<8x256xf32>
    %c0_59 = arith.constant 0 : index
    %c0_60 = arith.constant 0 : index
    %c0_61 = arith.constant 0 : index
    %86 = vector.load %arg2[%c0_59, %c0_60, %c0_61] : memref<9x1x256xf32, #tpu.memory_space<vmem>>, vector<1x1x256xf32>
    %87 = vector.shape_cast %86 : vector<1x1x256xf32> to vector<1x256xf32>
    %88 = vector.broadcast %87 : vector<1x256xf32> to vector<8x256xf32>
    %89 = arith.mulf %85, %88 : vector<8x256xf32>
    %c0_62 = arith.constant 0 : index
    %c0_63 = arith.constant 0 : index
    %c0_64 = arith.constant 0 : index
    %90 = vector.load %arg5[%c0_62, %c0_63, %c0_64] : memref<9x8x8xf32, #tpu.memory_space<vmem>>, vector<1x8x8xf32>
    %91 = vector.shape_cast %90 : vector<1x8x8xf32> to vector<8x8xf32>
    %cst_65 = arith.constant dense<0.000000e+00> : vector<8x256xf32>
    %92 = tpu.matmul %91, %89, %cst_65 {dimension_numbers = #tpu.dot_dimension_numbers<[1], [0], [0], [1], [0, 0, 1, 1], [], []>} : vector<8x8xf32>, vector<8x256xf32>, vector<8x256xf32> -> vector<8x256xf32>
    %93 = arith.addf %84, %92 : vector<8x256xf32>
    %c16_i32_66 = arith.constant 16 : i32
    %94 = tpu.dynamic_rotate %83 by %c16_i32_66 dim 1 : vector<8x256xf32>, i32 -> vector<8x256xf32>
    %c1_67 = arith.constant 1 : index
    %c0_68 = arith.constant 0 : index
    %c0_69 = arith.constant 0 : index
    %95 = vector.load %arg2[%c1_67, %c0_68, %c0_69] : memref<9x1x256xf32, #tpu.memory_space<vmem>>, vector<1x1x256xf32>
    %96 = vector.shape_cast %95 : vector<1x1x256xf32> to vector<1x256xf32>
    %97 = vector.broadcast %96 : vector<1x256xf32> to vector<8x256xf32>
    %98 = arith.mulf %94, %97 : vector<8x256xf32>
    %c1_70 = arith.constant 1 : index
    %c0_71 = arith.constant 0 : index
    %c0_72 = arith.constant 0 : index
    %99 = vector.load %arg5[%c1_70, %c0_71, %c0_72] : memref<9x8x8xf32, #tpu.memory_space<vmem>>, vector<1x8x8xf32>
    %100 = vector.shape_cast %99 : vector<1x8x8xf32> to vector<8x8xf32>
    %cst_73 = arith.constant dense<0.000000e+00> : vector<8x256xf32>
    %101 = tpu.matmul %100, %98, %cst_73 {dimension_numbers = #tpu.dot_dimension_numbers<[1], [0], [0], [1], [0, 0, 1, 1], [], []>} : vector<8x8xf32>, vector<8x256xf32>, vector<8x256xf32> -> vector<8x256xf32>
    %102 = arith.addf %93, %101 : vector<8x256xf32>
    %c15_i32_74 = arith.constant 15 : i32
    %103 = tpu.dynamic_rotate %83 by %c15_i32_74 dim 1 : vector<8x256xf32>, i32 -> vector<8x256xf32>
    %c2_75 = arith.constant 2 : index
    %c0_76 = arith.constant 0 : index
    %c0_77 = arith.constant 0 : index
    %104 = vector.load %arg2[%c2_75, %c0_76, %c0_77] : memref<9x1x256xf32, #tpu.memory_space<vmem>>, vector<1x1x256xf32>
    %105 = vector.shape_cast %104 : vector<1x1x256xf32> to vector<1x256xf32>
    %106 = vector.broadcast %105 : vector<1x256xf32> to vector<8x256xf32>
    %107 = arith.mulf %103, %106 : vector<8x256xf32>
    %c2_78 = arith.constant 2 : index
    %c0_79 = arith.constant 0 : index
    %c0_80 = arith.constant 0 : index
    %108 = vector.load %arg5[%c2_78, %c0_79, %c0_80] : memref<9x8x8xf32, #tpu.memory_space<vmem>>, vector<1x8x8xf32>
    %109 = vector.shape_cast %108 : vector<1x8x8xf32> to vector<8x8xf32>
    %cst_81 = arith.constant dense<0.000000e+00> : vector<8x256xf32>
    %110 = tpu.matmul %109, %107, %cst_81 {dimension_numbers = #tpu.dot_dimension_numbers<[1], [0], [0], [1], [0, 0, 1, 1], [], []>} : vector<8x8xf32>, vector<8x256xf32>, vector<8x256xf32> -> vector<8x256xf32>
    %111 = arith.addf %102, %110 : vector<8x256xf32>
    %c1_i32_82 = arith.constant 1 : i32
    %112 = tpu.dynamic_rotate %83 by %c1_i32_82 dim 1 : vector<8x256xf32>, i32 -> vector<8x256xf32>
    %c3_83 = arith.constant 3 : index
    %c0_84 = arith.constant 0 : index
    %c0_85 = arith.constant 0 : index
    %113 = vector.load %arg2[%c3_83, %c0_84, %c0_85] : memref<9x1x256xf32, #tpu.memory_space<vmem>>, vector<1x1x256xf32>
    %114 = vector.shape_cast %113 : vector<1x1x256xf32> to vector<1x256xf32>
    %115 = vector.broadcast %114 : vector<1x256xf32> to vector<8x256xf32>
    %116 = arith.mulf %112, %115 : vector<8x256xf32>
    %c3_86 = arith.constant 3 : index
    %c0_87 = arith.constant 0 : index
    %c0_88 = arith.constant 0 : index
    %117 = vector.load %arg5[%c3_86, %c0_87, %c0_88] : memref<9x8x8xf32, #tpu.memory_space<vmem>>, vector<1x8x8xf32>
    %118 = vector.shape_cast %117 : vector<1x8x8xf32> to vector<8x8xf32>
    %cst_89 = arith.constant dense<0.000000e+00> : vector<8x256xf32>
    %119 = tpu.matmul %118, %116, %cst_89 {dimension_numbers = #tpu.dot_dimension_numbers<[1], [0], [0], [1], [0, 0, 1, 1], [], []>} : vector<8x8xf32>, vector<8x256xf32>, vector<8x256xf32> -> vector<8x256xf32>
    %120 = arith.addf %111, %119 : vector<8x256xf32>
    %c4_90 = arith.constant 4 : index
    %c0_91 = arith.constant 0 : index
    %c0_92 = arith.constant 0 : index
    %121 = vector.load %arg5[%c4_90, %c0_91, %c0_92] : memref<9x8x8xf32, #tpu.memory_space<vmem>>, vector<1x8x8xf32>
    %122 = vector.shape_cast %121 : vector<1x8x8xf32> to vector<8x8xf32>
    %cst_93 = arith.constant dense<0.000000e+00> : vector<8x256xf32>
    %123 = tpu.matmul %122, %83, %cst_93 {dimension_numbers = #tpu.dot_dimension_numbers<[1], [0], [0], [1], [0, 0, 1, 1], [], []>} : vector<8x8xf32>, vector<8x256xf32>, vector<8x256xf32> -> vector<8x256xf32>
    %124 = arith.addf %120, %123 : vector<8x256xf32>
    %c255_i32_94 = arith.constant 255 : i32
    %125 = tpu.dynamic_rotate %83 by %c255_i32_94 dim 1 : vector<8x256xf32>, i32 -> vector<8x256xf32>
    %c5_95 = arith.constant 5 : index
    %c0_96 = arith.constant 0 : index
    %c0_97 = arith.constant 0 : index
    %126 = vector.load %arg2[%c5_95, %c0_96, %c0_97] : memref<9x1x256xf32, #tpu.memory_space<vmem>>, vector<1x1x256xf32>
    %127 = vector.shape_cast %126 : vector<1x1x256xf32> to vector<1x256xf32>
    %128 = vector.broadcast %127 : vector<1x256xf32> to vector<8x256xf32>
    %129 = arith.mulf %125, %128 : vector<8x256xf32>
    %c5_98 = arith.constant 5 : index
    %c0_99 = arith.constant 0 : index
    %c0_100 = arith.constant 0 : index
    %130 = vector.load %arg5[%c5_98, %c0_99, %c0_100] : memref<9x8x8xf32, #tpu.memory_space<vmem>>, vector<1x8x8xf32>
    %131 = vector.shape_cast %130 : vector<1x8x8xf32> to vector<8x8xf32>
    %cst_101 = arith.constant dense<0.000000e+00> : vector<8x256xf32>
    %132 = tpu.matmul %131, %129, %cst_101 {dimension_numbers = #tpu.dot_dimension_numbers<[1], [0], [0], [1], [0, 0, 1, 1], [], []>} : vector<8x8xf32>, vector<8x256xf32>, vector<8x256xf32> -> vector<8x256xf32>
    %133 = arith.addf %124, %132 : vector<8x256xf32>
    %c241_i32_102 = arith.constant 241 : i32
    %134 = tpu.dynamic_rotate %83 by %c241_i32_102 dim 1 : vector<8x256xf32>, i32 -> vector<8x256xf32>
    %c6_103 = arith.constant 6 : index
    %c0_104 = arith.constant 0 : index
    %c0_105 = arith.constant 0 : index
    %135 = vector.load %arg2[%c6_103, %c0_104, %c0_105] : memref<9x1x256xf32, #tpu.memory_space<vmem>>, vector<1x1x256xf32>
    %136 = vector.shape_cast %135 : vector<1x1x256xf32> to vector<1x256xf32>
    %137 = vector.broadcast %136 : vector<1x256xf32> to vector<8x256xf32>
    %138 = arith.mulf %134, %137 : vector<8x256xf32>
    %c6_106 = arith.constant 6 : index
    %c0_107 = arith.constant 0 : index
    %c0_108 = arith.constant 0 : index
    %139 = vector.load %arg5[%c6_106, %c0_107, %c0_108] : memref<9x8x8xf32, #tpu.memory_space<vmem>>, vector<1x8x8xf32>
    %140 = vector.shape_cast %139 : vector<1x8x8xf32> to vector<8x8xf32>
    %cst_109 = arith.constant dense<0.000000e+00> : vector<8x256xf32>
    %141 = tpu.matmul %140, %138, %cst_109 {dimension_numbers = #tpu.dot_dimension_numbers<[1], [0], [0], [1], [0, 0, 1, 1], [], []>} : vector<8x8xf32>, vector<8x256xf32>, vector<8x256xf32> -> vector<8x256xf32>
    %142 = arith.addf %133, %141 : vector<8x256xf32>
    %c240_i32_110 = arith.constant 240 : i32
    %143 = tpu.dynamic_rotate %83 by %c240_i32_110 dim 1 : vector<8x256xf32>, i32 -> vector<8x256xf32>
    %c7_111 = arith.constant 7 : index
    %c0_112 = arith.constant 0 : index
    %c0_113 = arith.constant 0 : index
    %144 = vector.load %arg2[%c7_111, %c0_112, %c0_113] : memref<9x1x256xf32, #tpu.memory_space<vmem>>, vector<1x1x256xf32>
    %145 = vector.shape_cast %144 : vector<1x1x256xf32> to vector<1x256xf32>
    %146 = vector.broadcast %145 : vector<1x256xf32> to vector<8x256xf32>
    %147 = arith.mulf %143, %146 : vector<8x256xf32>
    %c7_114 = arith.constant 7 : index
    %c0_115 = arith.constant 0 : index
    %c0_116 = arith.constant 0 : index
    %148 = vector.load %arg5[%c7_114, %c0_115, %c0_116] : memref<9x8x8xf32, #tpu.memory_space<vmem>>, vector<1x8x8xf32>
    %149 = vector.shape_cast %148 : vector<1x8x8xf32> to vector<8x8xf32>
    %cst_117 = arith.constant dense<0.000000e+00> : vector<8x256xf32>
    %150 = tpu.matmul %149, %147, %cst_117 {dimension_numbers = #tpu.dot_dimension_numbers<[1], [0], [0], [1], [0, 0, 1, 1], [], []>} : vector<8x8xf32>, vector<8x256xf32>, vector<8x256xf32> -> vector<8x256xf32>
    %151 = arith.addf %142, %150 : vector<8x256xf32>
    %c239_i32_118 = arith.constant 239 : i32
    %152 = tpu.dynamic_rotate %83 by %c239_i32_118 dim 1 : vector<8x256xf32>, i32 -> vector<8x256xf32>
    %c8_119 = arith.constant 8 : index
    %c0_120 = arith.constant 0 : index
    %c0_121 = arith.constant 0 : index
    %153 = vector.load %arg2[%c8_119, %c0_120, %c0_121] : memref<9x1x256xf32, #tpu.memory_space<vmem>>, vector<1x1x256xf32>
    %154 = vector.shape_cast %153 : vector<1x1x256xf32> to vector<1x256xf32>
    %155 = vector.broadcast %154 : vector<1x256xf32> to vector<8x256xf32>
    %156 = arith.mulf %152, %155 : vector<8x256xf32>
    %c8_122 = arith.constant 8 : index
    %c0_123 = arith.constant 0 : index
    %c0_124 = arith.constant 0 : index
    %157 = vector.load %arg5[%c8_122, %c0_123, %c0_124] : memref<9x8x8xf32, #tpu.memory_space<vmem>>, vector<1x8x8xf32>
    %158 = vector.shape_cast %157 : vector<1x8x8xf32> to vector<8x8xf32>
    %cst_125 = arith.constant dense<0.000000e+00> : vector<8x256xf32>
    %159 = tpu.matmul %158, %156, %cst_125 {dimension_numbers = #tpu.dot_dimension_numbers<[1], [0], [0], [1], [0, 0, 1, 1], [], []>} : vector<8x8xf32>, vector<8x256xf32>, vector<8x256xf32> -> vector<8x256xf32>
    %160 = arith.addf %151, %159 : vector<8x256xf32>
    %c0_126 = arith.constant 0 : index
    %c0_127 = arith.constant 0 : index
    %161 = vector.load %arg6[%c0_126, %c0_127] : memref<8x1xf32, #tpu.memory_space<vmem>>, vector<8x1xf32>
    %162 = vector.broadcast %161 : vector<8x1xf32> to vector<8x256xf32>
    %163 = arith.addf %160, %162 : vector<8x256xf32>
    %cst_128 = arith.constant 0.000000e+00 : f32
    %164 = vector.broadcast %cst_128 : f32 to vector<8x256xf32>
    %165 = arith.maximumf %163, %164 : vector<8x256xf32>
    %c0_129 = arith.constant 0 : index
    %c0_130 = arith.constant 0 : index
    %c0_131 = arith.constant 0 : index
    %166 = vector.load %arg7[%c0_129, %c0_130, %c0_131] : memref<1x8x256xf32, #tpu.memory_space<vmem>>, vector<1x8x256xf32>
    %167 = vector.shape_cast %166 : vector<1x8x256xf32> to vector<8x256xf32>
    %168 = vector.shape_cast %165 : vector<8x256xf32> to vector<1x8x256xf32>
    tpu.vector_store %arg7[%c0_129, %c0_130, %c0_131], %168 {strides = array<i32>} : memref<1x8x256xf32, #tpu.memory_space<vmem>>, vector<1x8x256xf32>,
    return
  }
  func.func @transform_0(%arg0: i32) -> (i32, i32, i32) {
    %c0_i32 = arith.constant 0 : i32
    %c0_i32_0 = arith.constant 0 : i32
    %c0_i32_1 = arith.constant 0 : i32
    return %arg0, %c0_i32, %c0_i32_0 : i32, i32, i32
  }
  func.func @transform_1(%arg0: i32) -> (i32, i32, i32) {
    %c0_i32 = arith.constant 0 : i32
    %c0_i32_0 = arith.constant 0 : i32
    %c0_i32_1 = arith.constant 0 : i32
    %c0_i32_2 = arith.constant 0 : i32
    return %c0_i32, %c0_i32_0, %c0_i32_1 : i32, i32, i32
  }
  func.func @transform_2(%arg0: i32) -> (i32, i32, i32) {
    %c0_i32 = arith.constant 0 : i32
    %c0_i32_0 = arith.constant 0 : i32
    %c0_i32_1 = arith.constant 0 : i32
    %c0_i32_2 = arith.constant 0 : i32
    return %c0_i32, %c0_i32_0, %c0_i32_1 : i32, i32, i32
  }
  func.func @transform_3(%arg0: i32) -> (i32, i32) {
    %c0_i32 = arith.constant 0 : i32
    %c0_i32_0 = arith.constant 0 : i32
    %c0_i32_1 = arith.constant 0 : i32
    return %c0_i32, %c0_i32_0 : i32, i32
  }
  func.func @transform_4(%arg0: i32) -> (i32, i32, i32) {
    %c0_i32 = arith.constant 0 : i32
    %c0_i32_0 = arith.constant 0 : i32
    %c0_i32_1 = arith.constant 0 : i32
    %c0_i32_2 = arith.constant 0 : i32
    return %c0_i32, %c0_i32_0, %c0_i32_1 : i32, i32, i32
  }
  func.func @transform_5(%arg0: i32) -> (i32, i32) {
    %c0_i32 = arith.constant 0 : i32
    %c0_i32_0 = arith.constant 0 : i32
    %c0_i32_1 = arith.constant 0 : i32
    return %c0_i32, %c0_i32_0 : i32, i32
  }
  func.func @transform_6(%arg0: i32) -> (i32, i32, i32) {
    %c0_i32 = arith.constant 0 : i32
    %c0_i32_0 = arith.constant 0 : i32
    %c0_i32_1 = arith.constant 0 : i32
    return %arg0, %c0_i32, %c0_i32_0 : i32, i32, i32
  }
}

</mosaic_0001>

<bundles_post_ra>
// kernel: double_conv.1
= control target key start
LH: loop header
LB: loop body
LE: loop exit
PB: predicated region body
PF: predicated region fallthrough
CT: control target
= control target key end

     0   :  { %s2168_s21 = smov 0   ;;  %s2541_s0 = inlined_call_operand.vmem [shape: f32[2,4,256], index: 0, kind: input, shape index: {}]   ;;  %s2542_s1 = inlined_call_operand.vmem [shape: f32[9,1,256], index: 1, kind: input, shape index: {}]   ;;  %s2543_s2 = inlined_call_operand.vmem [shape: f32[9,8,4], index: 2, kind: input, shape index: {}]   ;;  %s2544_s3 = inlined_call_operand.vmem [shape: f32[8,1], index: 3, kind: input, shape index: {}]   ;;  %s2545_s4 = inlined_call_operand.vmem [shape: f32[9,8,8], index: 4, kind: input, shape index: {}]   ;;  %s2546_s5 = inlined_call_operand.vmem [shape: f32[8,1], index: 5, kind: input, shape index: {}]   ;;  %s2547_s6 = inlined_call_operand.vmem [shape: f32[2,8,256], index: 6, kind: output, shape index: {}]  }
   0x1 LB: > { %s2023_s22 = sadd.s32 4294967295, %s2121_s21   ;;  %p2027_p0 = scmp.ge.s32.totalorder %s2121_s21, 1  ;;  %s2121_s21 = sphi %s2168_s21, %s16_s21  }
   0x2   : > { %p212_p1 = scmp.lt.s32.totalorder %s2121_s21, 3 }
   0x4   : > { %p213_p2 = pnand %p2027_p0, %p212_p1 }
   0x5   : > { %p242_p3 = scmp.lt.s32.totalorder (!%p213_p2), %s2023_s22, 1  ;;  %s2124_s27 = smov (!%p213_p2), 17  }
   0x6   : > { %216 = sbr.rel (%p213_p2) target bundleno = 716 (0x2cc), region = 44  ;;  %s2125_s28 = smov (!%p213_p2), 16  }
   0x7   : > { %s2126_s29 = smov (!%p213_p2), 15   ;;  %s2127_s30 = smov (!%p213_p2), 1  }
   0x8   : > { %s2128_s7 = smov (!%p213_p2), 127   ;;  %s2129_s8 = smov (!%p213_p2), 113  }
   0x9   : > { %s2131_s9 = smov (!%p213_p2), 112   ;;  %s2132_s10 = smov (!%p213_p2), 111  }
   0xb   : > { %s2549_s22 = smov (!%p242_p3, %s2023_s22), 1  ;;  %v2123_v1 = vmov 0.0   ;;  %v2130_v3 = vmov 0   ;;  %v1184_v4 = vld [vmem:[%s2544_s3] sm:$0xff]  ;;  %v260_v5 = vlaneseq  ;;  %vm308_vm1 = vcmask 1043456   ;;  %v2033_v40 = vld [vmem:[%s2543_s2 + $0x8] sm:$0xff] }
   0xc   : > { %s2093_s23 = sshll.u32 %s2549_s22, 3  ;;  %379 = vmatprep.mubr.f32.mxu0 %v2123_v1  ;;  %459 = vmatprep.mubr.f32.mxu1 %v2123_v1  ;;  %v265_v10 = vld [vmem:[%s2542_s1] sm:$0x3]  ;;  %v2032_v15 = vld [vmem:[%s2542_s1 + $0x2] sm:$0x3]  ;;  %vm304_vm5 = vcmask 31744  }
   0xd   : > { %s246_s26 = scalar_lea.vmem %s2541_s0, %s2093_s23  ;;  %2113 = vset.pattern.permute.xlu0 %v2130_v3  ;;  %v268_v6 = vshrl.u32 %v260_v5, 7  ;;  %v2225_v7 = vand.u32 127, %v260_v5  ;;  %v2040_v20 = vld [vmem:[%s2542_s1 + $0x4] sm:$0x3]  ;;  %v2045_v25 = vld [vmem:[%s2542_s1 + $0x6] sm:$0x3] }
   0xe   : > { %v2182_v0 = vld [vmem:[%s246_s26] sm:$0xff]  ;;  %v2054_v39 = vld [vmem:[%s2542_s1 + $0xa] sm:$0x3]  ;;  %v2059_v51 = vld [vmem:[%s2542_s1 + $0xc] sm:$0x3]  ;;  %vm1213_vm10 = vcmask 64512  }
   0xf   : > { %256 = vrot.lane.b32.xlu1 %v2182_v0, %s2124_s27  ;;  %280 = vrot.lane.b32.xlu0 %v2182_v0, %s2125_s28  ;;  %v2191_v2 = vcombine.high %v2182_v0, %v2182_v0  ;;  %v2227_v8 = vsub.s32 0, %v268_v6  ;;  %v2229_v9 = vsub.s32 1, %v268_v6  ;;  %vm262_vm0 = vcmp.lt.s32.totalorder %v2225_v7, 17  ;;  %v279_v26 = vld [vmem:[%s2543_s2] sm:$0xff]  ;;  %v2041_v52 = vld [vmem:[%s2543_s2 + $0x10] sm:$0xff]  ;;  %s2094_s17 = sshll.u32 %s2549_s22, 4 }
  0x10   : > { %vm470_vm2 = vcmp.lt.s32.totalorder %v2225_v7, 15  ;;  %vm284_vm3 = vcmp.lt.s32.totalorder %v2225_v7, 16  ;;  %vm576_vm4 = vcmp.lt.s32.totalorder %v2225_v7, 1  ;;  %vm764_vm6 = vcmp.lt.s32.totalorder %v2225_v7, 127  ;;  %v2046_v53 = vld [vmem:[%s2543_s2 + $0x18] sm:$0xff]  ;;  %v2050_v63 = vld [vmem:[%s2543_s2 + $0x20] sm:$0xff]  ;;  %s251_s19 = scalar_lea.vmem %s2547_s6, %s2094_s17 }
  0x11   : > { %v2236_v13 = vrot.slane %v265_v10, %v2227_v8  ;;  %v2239_v14 = vrot.slane %v265_v10, %v2229_v9  ;;  %v2256_v23 = vrot.slane %v2032_v15, %v2227_v8  ;;  %v2259_v24 = vrot.slane %v2032_v15, %v2229_v9  ;;  %v2064_v62 = vld [vmem:[%s2542_s1 + $0xe] sm:$0x3]  ;;  %v2060_v15 = vld [vmem:[%s2543_s2 + $0x30] sm:$0xff] }
  0x12   : > { %v2269_v27 = vrot.slane %v2040_v20, %v2227_v8  ;;  %v2272_v28 = vrot.slane %v2040_v20, %v2229_v9  ;;  %v2283_v34 = vrot.slane %v2045_v25, %v2227_v8  ;;  %v2290_v38 = vrot.slane %v2045_v25, %v2229_v9 }
  0x13   : > { %466 = vrot.lane.b32.xlu0 %v2182_v0, %s2126_s29  ;;  %258 = vrot.lane.b32.xlu1 %v2191_v2, %s2124_s27  ;;  %v2309_v47 = vrot.slane %v2054_v39, %v2227_v8  ;;  %v2317_v50 = vrot.slane %v2054_v39, %v2229_v9  ;;  %v2339_v58 = vrot.slane %v2059_v51, %v2227_v8  ;;  %vm870_vm7 = vcmp.lt.s32.totalorder %v2225_v7, 113 }
  0x14   : > { %v2347_v61 = vrot.slane %v2059_v51, %v2229_v9  ;;  %v2369_v6 = vrot.slane %v2064_v62, %v2227_v8  ;;  %vm976_vm8 = vcmp.lt.s32.totalorder %v2225_v7, 112  ;;  %vm1082_vm9 = vcmp.lt.s32.totalorder %v2225_v7, 111 }
  0x17   : > { %468 = vrot.lane.b32.xlu1 %v2191_v2, %s2126_s29  ;;  %282 = vrot.lane.b32.xlu0 %v2191_v2, %s2125_s28 }
  0x1b   : > { %574 = vrot.lane.b32.xlu1 %v2191_v2, %s2127_s30  ;;  %572 = vrot.lane.b32.xlu0 %v2182_v0, %s2127_s30 }
  0x1f   : > { %762 = vrot.lane.b32.xlu1 %v2191_v2, %s2128_s7  ;;  %760 = vrot.lane.b32.xlu0 %v2182_v0, %s2128_s7 }
  0x23   : > { %868 = vrot.lane.b32.xlu1 %v2191_v2, %s2129_s8  ;;  %866 = vrot.lane.b32.xlu0 %v2182_v0, %s2129_s8 }
  0x27   : > { %974 = vrot.lane.b32.xlu1 %v2191_v2, %s2131_s9  ;;  %972 = vrot.lane.b32.xlu0 %v2182_v0, %s2131_s9 }
  0x2b   : > { %1080 = vrot.lane.b32.xlu1 %v2191_v2, %s2132_s10  ;;  %1078 = vrot.lane.b32.xlu0 %v2182_v0, %s2132_s10 }
  0x2f   : > { %1187 = vperm.xlu0 %2113, %v1184_v4  }
  0x81   : > { %v257_v11 = vpop.permute.xlu1 %256  ;;  %v281_v12 = vpop.permute.xlu0 %280 }
  0x85   : > { %v467_v16 = vpop.permute.xlu0 %466  ;;  %v259_v17 = vpop.permute.xlu1 %258 }
  0x86   : > { %v263_v18 = vsel %vm262_vm0, %v257_v11, %v259_v17  ;;  %v264_v19 = vsel %vm262_vm0, %v259_v17, %v257_v11 }
  0x87   : > { %v277_v21 = vmul.f32 %v2236_v13, %v264_v19  ;;  %v278_v22 = vmul.f32 %v2239_v14, %v263_v18 }
  0x89   : > { %2037 = vmatprep.subr.msk.mxu1 %vm308_vm1, %v278_v22  ;;  %v469_v29 = vpop.permute.xlu1 %468  ;;  %v283_v30 = vpop.permute.xlu0 %282 }
  0x8a   : > { %v471_v31 = vsel %vm470_vm2, %v467_v16, %v469_v29  ;;  %v285_v32 = vsel %vm284_vm3, %v281_v12, %v283_v30  ;;  %v286_v33 = vsel %vm284_vm3, %v283_v30, %v281_v12  ;;  %2038 = vmatpush1.msk.msra.mxu1 %vm308_vm1, %v277_v21  ;;  %v472_v35 = vsel %vm470_vm2, %v469_v29, %v467_v16  ;;  %v2069_v16 = vld [vmem:[%s2542_s1 + $0x10] sm:$0x3]  ;;  %v2065_v29 = vld [vmem:[%s2543_s2 + $0x38] sm:$0xff] }
  0x8b   : > { %v300_v36 = vmul.f32 %v2256_v23, %v286_v33  ;;  %v301_v37 = vmul.f32 %v2259_v24, %v285_v32  ;;  %2039 = vmatmul.mubr.msk.f32.vlgmr.msra.gmra.mxu1 %vm304_vm5, %v279_v26  ;;  %v487_v41 = vmul.f32 %v2272_v28, %v471_v31  ;;  %v486_v44 = vmul.f32 %v2269_v27, %v472_v35  ;;  %v2070_v35 = vld [vmem:[%s2543_s2 + $0x40] sm:$0xff] }
  0x8c   : > { %669 = vmatprep.mubr.f32.mxu1 %v2123_v1  ;;  %v2377_v12 = vrot.slane %v2064_v62, %v2229_v9  ;;  %v2398_v25 = vrot.slane %v2069_v16, %v2227_v8  ;;  %v2401_v26 = vrot.slane %v2069_v16, %v2229_v9 }
  0x8d   : > { %v575_v42 = vpop.permute.xlu1 %574  ;;  %2034 = vmatprep.subr.msk.mxu0 %vm308_vm1, %v301_v37  ;;  %v573_v43 = vpop.permute.xlu0 %572 }
  0x8e   : > { %v577_v45 = vsel %vm576_vm4, %v573_v43, %v575_v42  ;;  %v578_v46 = vsel %vm576_vm4, %v575_v42, %v573_v43  ;;  %2035 = vmatpush1.msk.msra.mxu0 %vm308_vm1, %v300_v36 }
  0x8f   : > { %v592_v48 = vmul.f32 %v2283_v34, %v578_v46  ;;  %v593_v49 = vmul.f32 %v2290_v38, %v577_v45  ;;  %2036 = vmatmul.mubr.msk.f32.vlgmr.msra.gmra.mxu0 %vm304_vm5, %v2033_v40  ;;  %2042 = vmatprep.subr.msk.mxu0 %vm308_vm1, %v487_v41 }
  0x90   : > { %2043 = vmatpush1.msk.msra.mxu0 %vm308_vm1, %v486_v44  ;;  %563 = vmatprep.mubr.f32.mxu0 %v2123_v1 }
  0x91   : > { %v763_v54 = vpop.permute.xlu1 %762  ;;  %2047 = vmatprep.subr.msk.mxu1 %vm308_vm1, %v593_v49  ;;  %v761_v55 = vpop.permute.xlu0 %760  ;;  %2051 = vmatprep.subr.msk.mxu0 %vm308_vm1, %v2191_v2  ;;  %v2055_v2 = vld [vmem:[%s2543_s2 + $0x28] sm:$0xff] }
  0x92   : > { %v765_v56 = vsel %vm764_vm6, %v761_v55, %v763_v54  ;;  %v766_v57 = vsel %vm764_vm6, %v763_v54, %v761_v55  ;;  %2048 = vmatpush1.msk.msra.mxu1 %vm308_vm1, %v592_v48 }
  0x93   : > { %v780_v59 = vmul.f32 %v2309_v47, %v765_v56  ;;  %v781_v60 = vmul.f32 %v2317_v50, %v766_v57  ;;  %2044 = vmatmul.mubr.msk.f32.vlgmr.msra.gmra.mxu0 %vm304_vm5, %v2041_v52  ;;  %2049 = vmatmul.mubr.msk.f32.vlgmr.msra.gmra.mxu1 %vm304_vm5, %v2046_v53 }
  0x94   : > { %2052 = vmatpush1.msk.msra.mxu0 %vm308_vm1, %v2182_v0  ;;  %751 = vmatprep.mubr.f32.mxu0 %v2123_v1 }
  0x95   : > { %v869_v3 = vpop.permute.xlu1 %868  ;;  %2056 = vmatprep.subr.msk.mxu1 %vm308_vm1, %v781_v60  ;;  %v867_v4 = vpop.permute.xlu0 %866  ;;  %857 = vmatprep.mubr.f32.mxu1 %v2123_v1 }
  0x96   : > { %v871_v5 = vsel %vm870_vm7, %v867_v4, %v869_v3  ;;  %v872_v0 = vsel %vm870_vm7, %v869_v3, %v867_v4  ;;  %2057 = vmatpush1.msk.msra.mxu1 %vm308_vm1, %v780_v59 }
  0x97   : > { %v886_v10 = vmul.f32 %v2339_v58, %v871_v5  ;;  %v887_v11 = vmul.f32 %v2347_v61, %v872_v0  ;;  %2053 = vmatmul.mubr.msk.f32.vlgmr.msra.gmra.mxu0 %vm304_vm5, %v2050_v63  ;;  %2058 = vmatmul.mubr.msk.f32.vlgmr.msra.gmra.mxu1 %vm304_vm5, %v2055_v2 }
  0x98   : > { %963 = vmatprep.mubr.f32.mxu0 %v2123_v1  ;;  %1069 = vmatprep.mubr.f32.mxu1 %v2123_v1 }
  0x99   : > { %v975_v17 = vpop.permute.xlu1 %974  ;;  %2061 = vmatprep.subr.msk.mxu0 %vm308_vm1, %v887_v11  ;;  %v973_v18 = vpop.permute.xlu0 %972 }
  0x9a   : > { %v977_v19 = vsel %vm976_vm8, %v973_v18, %v975_v17  ;;  %v978_v20 = vsel %vm976_vm8, %v975_v17, %v973_v18  ;;  %2062 = vmatpush1.msk.msra.mxu0 %vm308_vm1, %v886_v10 }
  0x9b   : > { %v992_v21 = vmul.f32 %v2369_v6, %v977_v19  ;;  %v993_v22 = vmul.f32 %v2377_v12, %v978_v20  ;;  %2063 = vmatmul.mubr.msk.f32.vlgmr.msra.gmra.mxu0 %vm304_vm5, %v2060_v15 }
  0x9c   : > { %1175 = vmatprep.mubr.f32.mxu0 %v2123_v1 }
  0x9d   : > { %v1081_v30 = vpop.permute.xlu1 %1080  ;;  %2066 = vmatprep.subr.msk.mxu1 %vm308_vm1, %v993_v22  ;;  %v1079_v31 = vpop.permute.xlu0 %1078 }
  0x9e   : > { %v1083_v32 = vsel %vm1082_vm9, %v1079_v31, %v1081_v30  ;;  %v1084_v8 = vsel %vm1082_vm9, %v1081_v30, %v1079_v31  ;;  %2067 = vmatpush1.msk.msra.mxu1 %vm308_vm1, %v992_v21  ;;  %v1956_v30 = vld [vmem:[%s2546_s5] sm:$0xff] }
  0x9f   : > { %v1098_v9 = vmul.f32 %v2398_v25, %v1083_v32  ;;  %v1099_v33 = vmul.f32 %v2401_v26, %v1084_v8  ;;  %2068 = vmatmul.mubr.msk.f32.vlgmr.msra.gmra.mxu1 %vm304_vm5, %v2065_v29 }
  0xa0   : > { %1281 = vmatprep.mubr.f32.mxu1 %v2123_v1 }
  0xa1   : > { %2071 = vmatprep.subr.msk.mxu0 %vm308_vm1, %v1099_v33 }
  0xa2   : > { %2072 = vmatpush1.msk.msra.mxu0 %vm308_vm1, %v1098_v9 }
  0xa3   : > { %2073 = vmatmul.mubr.msk.f32.vlgmr.msra.gmra.mxu0 %vm304_vm5, %v2070_v35 }
  0xa4   : > { %1355 = vmatprep.mubr.f32.mxu0 %v2123_v1 }
  0xaa   : > { %v1188_v15 = vpop.permute.xlu0 %1187 }
 0x14b   : > { %v461_v36 = vpop.f32.mrf.mxu1 }
 0x14d   : > { %v463_v39 = vpop.f32.mrf.mxu1 }
 0x14f   : > { %v381_v37 = vpop.f32.mrf.mxu0 }
 0x150   : > { %v462_v40 = vadd.f32 %v461_v36, %v381_v37 }
 0x151   : > { %v383_v41 = vpop.f32.mrf.mxu0 }
 0x152   : > { %v464_v42 = vadd.f32 %v463_v39, %v383_v41  ;;  %v2074_v39 = vld [vmem:[%s2545_s4 + $0x8] sm:$0xff] }
 0x153   : > { %v565_v43 = vpop.f32.mrf.mxu0  ;;  %v671_v44 = vpop.f32.mrf.mxu1 }
 0x154   : > { %v570_v45 = vadd.f32 %v565_v43, %v462_v40 }
 0x155   : > { %v567_v46 = vpop.f32.mrf.mxu0  ;;  %v673_v48 = vpop.f32.mrf.mxu1 }
 0x156   : > { %v571_v49 = vadd.f32 %v567_v46, %v464_v42  ;;  %v676_v51 = vadd.f32 %v671_v44, %v570_v45 }
 0x157   : > { %v753_v52 = vpop.f32.mrf.mxu0  ;;  %v859_v53 = vpop.f32.mrf.mxu1 }
 0x158   : > { %v677_v54 = vadd.f32 %v673_v48, %v571_v49  ;;  %v758_v55 = vadd.f32 %v753_v52, %v676_v51  ;;  %v2077_v51 = vld [vmem:[%s2545_s4 + $0x10] sm:$0xff] }
 0x159   : > { %v755_v56 = vpop.f32.mrf.mxu0  ;;  %v861_v60 = vpop.f32.mrf.mxu1 }
 0x15a   : > { %v759_v57 = vadd.f32 %v755_v56, %v677_v54  ;;  %v864_v59 = vadd.f32 %v859_v53, %v758_v55  ;;  %v2079_v55 = vld [vmem:[%s2545_s4 + $0x18] sm:$0xff]  ;;  %v2081_v56 = vld [vmem:[%s2545_s4 + $0x20] sm:$0xff] }
 0x15b   : > { %v965_v62 = vpop.f32.mrf.mxu0 }
 0x15c   : > { %v865_v63 = vadd.f32 %v861_v60, %v759_v57  ;;  %v970_v2 = vadd.f32 %v965_v62, %v864_v59 }
 0x15d   : > { %v967_v3 = vpop.f32.mrf.mxu0 }
 0x15e   : > { %v971_v0 = vadd.f32 %v967_v3, %v865_v63  ;;  %v2083_v63 = vld [vmem:[%s2545_s4 + $0x28] sm:$0xff] }
 0x15f   : > { %v1071_v4 = vpop.f32.mrf.mxu1 }
 0x160   : > { %v1076_v10 = vadd.f32 %v1071_v4, %v970_v2 }
 0x161   : > { %v1073_v5 = vpop.f32.mrf.mxu1 }
 0x162   : > { %v1077_v16 = vadd.f32 %v1073_v5, %v971_v0  ;;  %v2085_v0 = vld [vmem:[%s2545_s4 + $0x30] sm:$0xff] }
 0x163   : > { %v1177_v11 = vpop.f32.mrf.mxu0 }
 0x164   : > { %v1182_v17 = vadd.f32 %v1177_v11, %v1076_v10 }
 0x165   : > { %v1179_v18 = vpop.f32.mrf.mxu0 }
 0x166   : > { %v1183_v19 = vadd.f32 %v1179_v18, %v1077_v16  ;;  %v1190_v20 = vadd.f32 %v1188_v15, %v1182_v17  ;;  %v2087_v16 = vld [vmem:[%s2545_s4 + $0x38] sm:$0xff] }
 0x168   : > { %v1191_v21 = vadd.f32 %v1188_v15, %v1183_v19  ;;  %v1192_v22 = vmax.f32 %v1190_v20, 0.0 }
 0x16a   : > { %1194 = vrot.lane.b32.xlu0 %v1192_v22, %s2124_s27  ;;  %1203 = vrot.lane.b32.xlu1 %v1192_v22, %s2125_s28  ;;  %v1193_v29 = vmax.f32 %v1191_v21, 0.0 }
 0x16e   : > { %1362 = vrot.lane.b32.xlu0 %v1192_v22, %s2126_s29  ;;  %1205 = vrot.lane.b32.xlu1 %v1193_v29, %s2125_s28 }
 0x172   : > { %1448 = vrot.lane.b32.xlu0 %v1192_v22, %s2127_s30  ;;  %1196 = vrot.lane.b32.xlu1 %v1193_v29, %s2124_s27 }
 0x176   : > { %1612 = vrot.lane.b32.xlu0 %v1192_v22, %s2128_s7  ;;  %1364 = vrot.lane.b32.xlu1 %v1193_v29, %s2126_s29 }
 0x17a   : > { %1698 = vrot.lane.b32.xlu0 %v1192_v22, %s2129_s8  ;;  %1450 = vrot.lane.b32.xlu1 %v1193_v29, %s2127_s30 }
 0x17e   : > { %1784 = vrot.lane.b32.xlu0 %v1192_v22, %s2131_s9  ;;  %1614 = vrot.lane.b32.xlu1 %v1193_v29, %s2128_s7 }
 0x182   : > { %1870 = vrot.lane.b32.xlu0 %v1192_v22, %s2132_s10  ;;  %1700 = vrot.lane.b32.xlu1 %v1193_v29, %s2129_s8 }
 0x186   : > { %1959 = vperm.xlu0 %2113, %v1956_v30   ;;  %1786 = vrot.lane.b32.xlu1 %v1193_v29, %s2131_s9 }
 0x18a   : > { %1872 = vrot.lane.b32.xlu1 %v1193_v29, %s2132_s10 }
 0x1dc   : > { %v1195_v31 = vpop.permute.xlu0 %1194  ;;  %v1204_v32 = vpop.permute.xlu1 %1203 }
 0x1e0   : > { %v1363_v8 = vpop.permute.xlu0 %1362  ;;  %v1206_v9 = vpop.permute.xlu1 %1205 }
 0x1e1   : > { %v1207_v33 = vsel %vm284_vm3, %v1204_v32, %v1206_v9  ;;  %v1208_v35 = vsel %vm284_vm3, %v1206_v9, %v1204_v32 }
 0x1e2   : > { %v1209_v36 = vmul.f32 %v1208_v35, %v2256_v23  ;;  %v1210_v37 = vmul.f32 %v1207_v33, %v2259_v24  ;;  %v1202_v24 = vld [vmem:[%s2545_s4] sm:$0xff] }
 0x1e4   : > { %v1449_v40 = vpop.permute.xlu0 %1448  ;;  %1247 = vmatprep.subr.mxu1 %v1210_v37  ;;  %v1197_v41 = vpop.permute.xlu1 %1196 }
 0x1e5   : > { %v1198_v42 = vsel %vm262_vm0, %v1195_v31, %v1197_v41  ;;  %v1199_v43 = vsel %vm262_vm0, %v1197_v41, %v1195_v31  ;;  %1248 = vmatpush1.msra.mxu1 %v1209_v36 }
 0x1e6   : > { %v1200_v44 = vmul.f32 %v1199_v43, %v2236_v13  ;;  %v1201_v23 = vmul.f32 %v1198_v42, %v2239_v14  ;;  %2075 = vmatmul.mubr.msk.f32.vlgmr.msra.gmra.mxu1 %vm1213_vm10, %v2074_v39 }
 0x1e7   : > { %1439 = vmatprep.mubr.f32.mxu1 %v2123_v1 }
 0x1e8   : > { %1321 = vmatprep.subr.mxu0 %v1201_v23  ;;  %v1365_v45 = vpop.permute.xlu1 %1364  ;;  %v1613_v13 = vpop.permute.xlu0 %1612 }
 0x1e9   : > { %v1366_v46 = vsel %vm470_vm2, %v1363_v8, %v1365_v45  ;;  %v1367_v48 = vsel %vm470_vm2, %v1365_v45, %v1363_v8  ;;  %1322 = vmatpush1.msra.mxu0 %v1200_v44 }
 0x1ea   : > { %v1368_v14 = vmul.f32 %v1367_v48, %v2269_v27  ;;  %v1369_v49 = vmul.f32 %v1366_v46, %v2272_v28  ;;  %2076 = vmatmul.mubr.msk.f32.vlgmr.msra.gmra.mxu0 %vm1213_vm10, %v1202_v24 }
 0x1eb   : > { %1525 = vmatprep.mubr.f32.mxu0 %v2123_v1 }
 0x1ec   : > { %1405 = vmatprep.subr.mxu1 %v1369_v49  ;;  %v1451_v52 = vpop.permute.xlu1 %1450  ;;  %v1699_v57 = vpop.permute.xlu0 %1698 }
 0x1ed   : > { %v1452_v53 = vsel %vm576_vm4, %v1449_v40, %v1451_v52  ;;  %v1453_v54 = vsel %vm576_vm4, %v1451_v52, %v1449_v40  ;;  %1406 = vmatpush1.msra.mxu1 %v1368_v14 }
 0x1ee   : > { %v1454_v27 = vmul.f32 %v1453_v54, %v2283_v34  ;;  %v1455_v28 = vmul.f32 %v1452_v53, %v2290_v38  ;;  %1569 = vmatprep.subr.mxu1 %v1193_v29  ;;  %2078 = vmatmul.mubr.msk.f32.vlgmr.msra.gmra.mxu1 %vm1213_vm10, %v2077_v51 }
 0x1ef   : > { %1570 = vmatpush1.msra.mxu1 %v1192_v22  ;;  %1603 = vmatprep.mubr.f32.mxu1 %v2123_v1 }
 0x1f0   : > { %1491 = vmatprep.subr.mxu0 %v1455_v28  ;;  %v1615_v59 = vpop.permute.xlu1 %1614 }
 0x1f1   : > { %v1616_v34 = vsel %vm764_vm6, %v1613_v13, %v1615_v59  ;;  %v1617_v38 = vsel %vm764_vm6, %v1615_v59, %v1613_v13  ;;  %1492 = vmatpush1.msra.mxu0 %v1454_v27 }
 0x1f2   : > { %v1618_v60 = vmul.f32 %v1616_v34, %v2309_v47  ;;  %v1619_v62 = vmul.f32 %v1617_v38, %v2317_v50  ;;  %2080 = vmatmul.mubr.msk.f32.vlgmr.msra.gmra.mxu0 %vm1213_vm10, %v2079_v55  ;;  %2082 = vmatmul.mubr.msk.f32.vlgmr.msra.gmra.mxu1 %vm1213_vm10, %v2081_v56  ;;  %v1785_v50 = vpop.permute.xlu0 %1784 }
 0x1f3   : > { %1689 = vmatprep.mubr.f32.mxu0 %v2123_v1  ;;  %1775 = vmatprep.mubr.f32.mxu1 %v2123_v1 }
 0x1f4   : > { %1655 = vmatprep.subr.mxu0 %v1619_v62  ;;  %v1701_v2 = vpop.permute.xlu1 %1700 }
 0x1f5   : > { %v1702_v3 = vsel %vm870_vm7, %v1699_v57, %v1701_v2  ;;  %v1703_v47 = vsel %vm870_vm7, %v1701_v2, %v1699_v57  ;;  %1656 = vmatpush1.msra.mxu0 %v1618_v60 }
 0x1f6   : > { %v1704_v4 = vmul.f32 %v1702_v3, %v2339_v58  ;;  %v1705_v5 = vmul.f32 %v1703_v47, %v2347_v61  ;;  %2084 = vmatmul.mubr.msk.f32.vlgmr.msra.gmra.mxu0 %vm1213_vm10, %v2083_v63  ;;  %v1871_v17 = vpop.permute.xlu0 %1870 }
 0x1f7   : > { %1861 = vmatprep.mubr.f32.mxu0 %v2123_v1 }
 0x1f8   : > { %1741 = vmatprep.subr.mxu1 %v1705_v5  ;;  %v1787_v10 = vpop.permute.xlu1 %1786 }
 0x1f9   : > { %v1788_v11 = vsel %vm976_vm8, %v1785_v50, %v1787_v10  ;;  %v1789_v15 = vsel %vm976_vm8, %v1787_v10, %v1785_v50  ;;  %1742 = vmatpush1.msra.mxu1 %v1704_v4 }
 0x1fa   : > { %v1790_v58 = vmul.f32 %v1788_v11, %v2369_v6  ;;  %v1791_v61 = vmul.f32 %v1789_v15, %v2377_v12  ;;  %2086 = vmatmul.mubr.msk.f32.vlgmr.msra.gmra.mxu1 %vm1213_vm10, %v2085_v0 }
 0x1fb   : > { %1947 = vmatprep.mubr.f32.mxu1 %v2123_v1  ;;  %v2089_v1 = vld [vmem:[%s2545_s4 + $0x40] sm:$0xff] }
 0x1fc   : > { %1827 = vmatprep.subr.mxu0 %v1791_v61  ;;  %v1873_v18 = vpop.permute.xlu1 %1872 }
 0x1fd   : > { %v1874_v19 = vsel %vm1082_vm9, %v1871_v17, %v1873_v18  ;;  %v1875_v20 = vsel %vm1082_vm9, %v1873_v18, %v1871_v17  ;;  %1828 = vmatpush1.msra.mxu0 %v1790_v58 }
 0x1fe   : > { %v1876_v6 = vmul.f32 %v1874_v19, %v2398_v25  ;;  %v1877_v12 = vmul.f32 %v1875_v20, %v2401_v26  ;;  %2088 = vmatmul.mubr.msk.f32.vlgmr.msra.gmra.mxu0 %vm1213_vm10, %v2087_v16 }
 0x200   : > { %1913 = vmatprep.subr.mxu1 %v1877_v12 }
 0x201   : > { %1914 = vmatpush1.msra.mxu1 %v1876_v6  ;;  %v1960_v54 = vpop.permute.xlu0 %1959 }
 0x202   : > { %2090 = vmatmul.mubr.msk.f32.vlgmr.msra.gmra.mxu1 %vm1213_vm10, %v2089_v1 }
 0x2a6   : > { %v1283_v21 = vpop.f32.mrf.mxu1 }
 0x2a8   : > { %v1285_v22 = vpop.f32.mrf.mxu1 }
 0x2aa   : > { %v1357_v29 = vpop.f32.mrf.mxu0 }
 0x2ab   : > { %v1358_v7 = vadd.f32 %v1357_v29, %v1283_v21 }
 0x2ac   : > { %v1359_v30 = vpop.f32.mrf.mxu0 }
 0x2ad   : > { %v1360_v31 = vadd.f32 %v1359_v30, %v1285_v22 }
 0x2ae   : > { %v1441_v32 = vpop.f32.mrf.mxu1 }
 0x2af   : > { %v1446_v25 = vadd.f32 %v1441_v32, %v1358_v7 }
 0x2b0   : > { %v1443_v8 = vpop.f32.mrf.mxu1 }
 0x2b1   : > { %v1447_v26 = vadd.f32 %v1443_v8, %v1360_v31 }
 0x2b2   : > { %v1527_v9 = vpop.f32.mrf.mxu0  ;;  %v1605_v33 = vpop.f32.mrf.mxu1 }
 0x2b3   : > { %v1532_v35 = vadd.f32 %v1527_v9, %v1446_v25 }
 0x2b4   : > { %v1529_v36 = vpop.f32.mrf.mxu0  ;;  %v1607_v40 = vpop.f32.mrf.mxu1 }
 0x2b5   : > { %v1533_v37 = vadd.f32 %v1529_v36, %v1447_v26  ;;  %v1610_v39 = vadd.f32 %v1605_v33, %v1532_v35 }
 0x2b6   : > { %v1691_v41 = vpop.f32.mrf.mxu0 }
 0x2b7   : > { %v1611_v42 = vadd.f32 %v1607_v40, %v1533_v37  ;;  %v1696_v43 = vadd.f32 %v1691_v41, %v1610_v39 }
 0x2b8   : > { %v1693_v44 = vpop.f32.mrf.mxu0 }
 0x2b9   : > { %v1697_v24 = vadd.f32 %v1693_v44, %v1611_v42 }
 0x2ba   : > { %v1777_v23 = vpop.f32.mrf.mxu1 }
 0x2bb   : > { %v1782_v45 = vadd.f32 %v1777_v23, %v1696_v43 }
 0x2bc   : > { %v1779_v46 = vpop.f32.mrf.mxu1 }
 0x2bd   : > { %v1783_v14 = vadd.f32 %v1779_v46, %v1697_v24 }
 0x2be   : > { %v1863_v48 = vpop.f32.mrf.mxu0 }
 0x2bf   : > { %v1868_v49 = vadd.f32 %v1863_v48, %v1782_v45 }
 0x2c0   : > { %v1865_v13 = vpop.f32.mrf.mxu0 }
 0x2c1   : > { %v1869_v52 = vadd.f32 %v1865_v13, %v1783_v14 }
 0x2c2   : > { %v1949_v51 = vpop.f32.mrf.mxu1 }
 0x2c3   : > { %v1954_v53 = vadd.f32 %v1949_v51, %v1868_v49 }
 0x2c4   : > { %v1951_v27 = vpop.f32.mrf.mxu1 }
 0x2c5   : > { %v1962_v28 = vadd.f32 %v1960_v54, %v1954_v53  ;;  %v1955_v55 = vadd.f32 %v1951_v27, %v1869_v52 }
 0x2c7   : > { %v1964_v56 = vmax.f32 %v1962_v28, 0.0  ;;  %v1963_v57 = vadd.f32 %v1960_v54, %v1955_v55 }
 0x2c9   : > { %1966 = vst [vmem:[%s251_s19] sm:$0xff] %v1964_v56  ;;  %v1965_v59 = vmax.f32 %v1963_v57, 0.0 }
 0x2cb   : > { %1967 = vst [vmem:[%s251_s19 + $0x8] sm:$0xff] %v1965_v59 }
 0x2cc PF: > { %s16_s21 = sadd.s32 1, %s2121_s21  }
 0x2cd   : > { %p13_p4 = scmp.ge.s32.totalorder %s16_s21, 4  }
 0x2cf   :  { %15 = sbr.rel (!%p13_p4) target bundleno = 1 (0x1), region = 97 }

</bundles_post_ra>
